<compile_context>
chip_gen: v6e
topology: v6e:2x2x1
jax: 0.10.0
libtpu: 0.0.40
codegen_flags: <defaults>
</compile_context>

<pallas_src>
import jax
import jax.numpy as jnp
from jax.experimental import pallas as pl
from jax.experimental.pallas import tpu as pltpu

LANE = 128  # vreg lane width — output last dim padded to a multiple of this


def _silu_linear_kernel(x_ref, w_ref, o_ref):
    # Single invocation, full-array VMEM blocks (shapes are tiny).
    v1 = jnp.dot(x_ref[...], w_ref[...], preferred_element_type=jnp.float32)
    v2 = jax.nn.sigmoid(v1)            # f32 end-to-end (v5e has no bf16 VPU/EUP)
    o_ref[...] = (v1 * v2).astype(o_ref.dtype)


def silu_linear(x, w_t):
    """x: [N, K] float32, w_t: [K, M] float32 -> [N, M] float32 (SiLU of x @ w_t)."""
    N, K = x.shape
    K2, M = w_t.shape
    assert K == K2

    # Pad the output feature dim to a lane-dense multiple of 128 so the kernel
    # emits unmasked vector stores. Extra columns are zero -> SiLU(0) = 0.
    M_pad = ((M + LANE - 1) // LANE) * LANE
    if M_pad != M:
        w_padded = jnp.pad(w_t, ((0, 0), (0, M_pad - M)))
    else:
        w_padded = w_t

    out_padded = pl.pallas_call(
        _silu_linear_kernel,
        out_shape=jax.ShapeDtypeStruct((N, M_pad), jnp.float32),
        in_specs=[
            pl.BlockSpec(memory_space=pltpu.MemorySpace.VMEM),
            pl.BlockSpec(memory_space=pltpu.MemorySpace.VMEM),
        ],
        out_specs=pl.BlockSpec(memory_space=pltpu.MemorySpace.VMEM),
    )(x, w_padded)

    # Slice back to the true output width outside the kernel.
    return out_padded[:, :M]


# TODO(synk): if N grows large in the real workload, add a row-tiled grid
# (TILE_N ~ 512-1024, weight resident, "parallel" semantics for v7x's 2 TCs);
# at N=16 a grid is pure overhead.
silu_linear_jit = jax.jit(silu_linear)


if __name__ == "__main__":
    key = jax.random.PRNGKey(0)
    kx, kw = jax.random.split(key)

    # Input matching the module's expected shape: (16, 5)
    x = jax.random.normal(kx, (16, 5), dtype=jnp.float32)

    # Deterministic weight for nn.Linear(5, 10, bias=False):
    # PyTorch weight shape is [10, 5]; we keep it transposed as [5, 10].
    w = jax.random.normal(kw, (10, 5), dtype=jnp.float32) * 0.1
    w_t = w.T  # [5, 10]

    out = silu_linear_jit(x, w_t)
    out = jax.block_until_ready(out)

    # Reference check in plain JAX
    v1 = x @ w_t
    ref = v1 * jax.nn.sigmoid(v1)
    assert out.shape == ref.shape, "shape mismatch vs reference"
    assert jnp.allclose(out, ref, atol=1e-5, rtol=1e-5), "mismatch vs reference"

    print("KERNEL_OK")
</pallas_src>

<mosaic_0001>
module attributes {stable_mosaic.version = 11 : i64} {
  func.func @_silu_linear_kernel(%arg0: memref<16x5xf32, #tpu.memory_space<vmem>>, %arg1: memref<5x128xf32, #tpu.memory_space<vmem>>, %arg2: memref<16x128xf32, #tpu.memory_space<vmem>>) attributes {dimension_semantics = [], scalar_prefetch = 0 : i64, scratch_operands = 0 : i64, tpu.core_type = #tpu.core_type<tc>} {
    %c0 = arith.constant 0 : index
    %c0_0 = arith.constant 0 : index
    %0 = vector.load %arg0[%c0, %c0_0] : memref<16x5xf32, #tpu.memory_space<vmem>>, vector<16x5xf32>
    %c0_1 = arith.constant 0 : index
    %c0_2 = arith.constant 0 : index
    %1 = vector.load %arg1[%c0_1, %c0_2] : memref<5x128xf32, #tpu.memory_space<vmem>>, vector<5x128xf32>
    %cst = arith.constant dense<0.000000e+00> : vector<16x128xf32>
    %2 = tpu.matmul %0, %1, %cst {dimension_numbers = #tpu.dot_dimension_numbers<[1], [0], [0], [1], [0, 0, 1, 1], [], []>} : vector<16x5xf32>, vector<5x128xf32>, vector<16x128xf32> -> vector<16x128xf32>
    %3 = arith.negf %2 : vector<16x128xf32>
    %4 = math.exp %3 : vector<16x128xf32>
    %cst_3 = arith.constant 1.000000e+00 : f32
    %5 = vector.broadcast %cst_3 : f32 to vector<16x128xf32>
    %6 = arith.addf %5, %4 : vector<16x128xf32>
    %7 = arith.divf %5, %6 : vector<16x128xf32>
    %8 = arith.mulf %2, %7 : vector<16x128xf32>
    %c0_4 = arith.constant 0 : index
    %c0_5 = arith.constant 0 : index
    %9 = vector.load %arg2[%c0_4, %c0_5] : memref<16x128xf32, #tpu.memory_space<vmem>>, vector<16x128xf32>
    tpu.vector_store %arg2[%c0_4, %c0_5], %8 {strides = array<i32>} : memref<16x128xf32, #tpu.memory_space<vmem>>, vector<16x128xf32>,
    return
  }
}

</mosaic_0001>

<bundles_post_ra>
// kernel: silu_linear.1
= control target key start
LH: loop header
LB: loop body
LE: loop exit
PB: predicated region body
PF: predicated region fallthrough
CT: control target
= control target key end

     0   :  { %vm22_vm0 = vcmask 1044480   ;;  %vm15_vm1 = vcmask 39936   ;;  %s209_s0 = inlined_call_operand.vmem [shape: f32[16,5], index: 0, kind: input, shape index: {}]   ;;  %s210_s1 = inlined_call_operand.vmem [shape: f32[5,128], index: 1, kind: input, shape index: {}]   ;;  %s211_s2 = inlined_call_operand.hbm [shape: f32[16,128], index: 2, kind: output, shape index: {}]  }
   0x1   :  { %v14_v0 = vld [vmem:[%s210_s1] sm:$0x1f]  ;;  %v13_v2 = vld [vmem:[%s209_s0 + $0x8] sm:$0xff] }
   0x2   :  { %v12_v1 = vld [vmem:[%s209_s0] sm:$0xff]  ;;  %141 = vmatprep.subr.msk.mxu0 %vm22_vm0, %v14_v0 }
   0x3   :  { %143 = vmatprep.mubr.msk.f32.mxu0 %vm15_vm1, %v12_v1 }
   0x4   :  { %7 = vsyncpa [#allocation3], 0  ;;  %142 = vmatpush3.msk.msra.mxu0 %vm22_vm0, %v14_v0  ;;  %s179_s1 = smov [#allocation2]  }
   0x5   :  { %144 = vmatmul.mubr.msk.f32.vlgmr.msra.gmra.mxu0 %vm15_vm1, %v13_v2  ;;  %s122_s15 = sshll.u32 %s179_s1, 4  ;;  %s123_s15 = int_to_ptr.vmem [resolvable:$true] %s122_s15 }
   0x6   :  { %s157_s0 = scalar_lea.vmem %s123_s15, 256  ;;  %p162_p1 = scmp.lt.s32.totalorder %s123_s15, %s123_s15 }
   0x7   :  { %p158_p0 = scmp.ne.s32.totalorder %s123_s15, %s157_s0  ;;  %p163_p2 = scmp.lt.s32.totalorder %s157_s0, %s157_s0 }
   0x9   :  { %p164_p3 = por %p163_p2, %p162_p1 }
   0xb   :  { %p165_p4 = pnand %p164_p3, %p158_p0 }
  0xc5   :  { %v145_v3 = vpop.f32.mrf.mxu0 }
  0xc6   :  { %v137_v4 = vmul.f32 -1.442695, %v145_v3 }
  0xc7   :  { %v92_v5 = vpop.f32.mrf.mxu0 }
  0xc8   :  { %149 = vpow2.f32 %v137_v4  ;;  %v136_v6 = vmul.f32 -1.442695, %v92_v5 }
  0xca   :  { %151 = vpow2.f32 %v136_v6 }
  0xd5   :  { %v150_v7 = vpop.eup %149 }
  0xd6   :  { %v108_v8 = vadd.f32 1.0, %v150_v7 }
  0xd7   :  { %v152_v9 = vpop.eup %151 }
  0xd8   :  { %153 = vrcp.f32 %v108_v8  ;;  %v107_v10 = vadd.f32 1.0, %v152_v9 }
  0xda   :  { %155 = vrcp.f32 %v107_v10 }
  0xe5   :  { %v154_v11 = vpop.eup %153 }
  0xe6   :  { %v114_v12 = vmul.f32 %v154_v11, %v145_v3 }
  0xe7   :  { %v156_v13 = vpop.eup %155 }
  0xe8   :  { %116 = vst [vmem:[#allocation2 + $0x8] sm:$0xff] %v114_v12  ;;  %v113_v14 = vmul.f32 %v156_v13, %v92_v5 }
  0xea   :  { %115 = vst [vmem:[#allocation2] sm:$0xff] %v113_v14 }
  0xeb   :  { %168 = shalt.err (!%p165_p4)
}
  0xec   :  { %s180_s16 = smov 128   ;;  %s181_s17 = smov 8  }
  0xed   :  { %128 = dma.vmem_to_hbm [thread:$0]  %s123_s15, 256, %s211_s2, [#allocation3], %s180_s16, %s180_s16, %s181_s17  }
  0xee   :  { %177 = dma.done.wait [#allocation3], 256  }
  0xef   :  { %178 = vsyncadd [#allocation3], 4294967040 }
  0xf0   :  { %132 = vsyncpa [#allocation3], 1 }

</bundles_post_ra>
